<compile_context>
chip_gen: v6e
topology: v6e:2x2x1
jax: 0.10.0
libtpu: 0.0.40
codegen_flags: <defaults>
</compile_context>

<pallas_src>
import jax
import jax.numpy as jnp
from jax.experimental import pallas as pl
from jax.experimental.pallas import tpu as pltpu


def decoder_rnn_kernel(aux_ref,    # (T*B, A)       time-major flattened auxiliary
                       cur0_ref,   # (B, O=1)       initial current_pm25
                       h0_ref,     # (B, H)         hn[0]
                       w_ref,      # (H+A+4, 6H)    packed weights (see pack_decoder_params)
                       pred_ref):  # (T, B)         predictions, time-major
    B, H = h0_ref.shape
    G = 3 * H
    TB, A = aux_ref.shape
    T = TB // B

    # ---- Unpack the single packed weight operand (static slices, one DMA) ----
    w_wide  = w_ref[0:H, :]                           # (H, 6H) = [W_hh^T | W_out^T @ W_i_cur]
    w_i_aux = w_ref[H:H + A, 0:G]                     # (A, 3H)
    b_i_eff = w_ref[H + A:H + A + 1, 0:G]             # (1, 3H) = b_ih + b_out * w_i_cur
    b_h     = w_ref[H + A:H + A + 1, G:2 * G]         # (1, 3H) = b_hh
    w_i_cur = w_ref[H + A + 1:H + A + 2, 0:G]         # (1, 3H) W_ih^T row for current_pm25
    w_out   = w_ref[H + A + 2:H + A + 3, 0:H]         # (1, H)
    b_out   = w_ref[H + A + 3:H + A + 4, 0:1]         # (1, 1)

    h = h0_ref[...].astype(jnp.float32)               # (B, H)
    cur0 = cur0_ref[...].astype(jnp.float32)          # (B, 1)

    # ---- Hoisted, off-chain: aux-side gate pre-activations for every step ----
    # b_ih and (valid for steps >= 1) b_out * w_i_cur are already folded in.
    gi_aux = jnp.dot(aux_ref[...], w_i_aux,
                     preferred_element_type=jnp.float32) + b_i_eff        # (T*B, 3H)

    # Step-0 correction: explicit cur0 term, minus the folded b_out piece
    # (rank-1 VPU broadcast-multiply, off the chain).
    gi0 = gi_aux[0:B, :] + (cur0 - b_out) * w_i_cur                       # (B, 3H)

    # ---- Recurrent chain: exactly one (B, H) @ (H, 6H) MXU matmul per step ----
    hs = []
    for i in range(T):  # static unroll, T is small (PredictionTimePeriods)
        wide = jnp.dot(h, w_wide, preferred_element_type=jnp.float32)    # (B, 6H)
        gh = wide[:, :G] + b_h                                            # (B, 3H)
        if i == 0:
            gi = gi0
        else:
            # cur_{i-1} * w_i_cur == h_{i-1} @ (W_out^T @ W_i_cur) + b_out*w_i_cur,
            # added on the gi side so it is NOT scaled by r in the n gate.
            gi = gi_aux[i * B:(i + 1) * B, :] + wide[:, G:]               # (B, 3H)

        # PyTorch GRUCell semantics, [r | z | n] column order.
        # Fused [r|z] sigmoid over the contiguous 2H-lane slice (one EUP call).
        rz = jax.nn.sigmoid(gi[:, :2 * H] + gh[:, :2 * H])                # (B, 2H)
        r = rz[:, :H]
        z = rz[:, H:]
        n = jnp.tanh(gi[:, 2 * H:] + r * gh[:, 2 * H:])
        h = (1.0 - z) * n + z * h
        hs.append(h)

    # ---- All T output projections after the loop (off the chain) ----
    h_all = jnp.stack(hs, axis=0)                                         # (T, B, H)
    pred = jnp.sum(h_all * w_out[None], axis=-1) + b_out                  # (T, B)
    pred_ref[...] = pred.astype(pred_ref.dtype)


def pack_decoder_params(params):
    """Pack all decoder weights/biases into one f32 array (one HBM->VMEM DMA).

    Row layout (G = 3*H columns per half, total width 6*H):
      [0:H,     0:G ] : W_hh^T                      (per-step matmul RHS, left half)
      [0:H,     G:2G] : W_out^T @ W_i_cur           (rank-1, right half)
      [H:H+A,   0:G ] : W_ih^T rows for auxiliary features
      [H+A,     0:G ] : b_ih + b_out * w_i_cur      (effective input bias, steps>=1)
      [H+A,     G:2G] : b_hh
      [H+A+1,   0:G ] : w_i_cur (W_ih^T row for current_pm25)
      [H+A+2,   0:H ] : W_out row
      [H+A+3,   0:1 ] : b_out
    """
    w_i_aux, w_i_cur = params["w_i_aux"], params["w_i_cur"]
    b_i, w_h, b_h = params["b_i"], params["w_h"], params["b_h"]
    w_out, b_out = params["w_out"], params["b_out"]
    A, G = w_i_aux.shape
    H = w_h.shape[0]
    w_cc = w_out.T @ w_i_cur                       # (H, 3H) rank-1 fold
    b_i_eff = b_i + b_out * w_i_cur                # (1, 3H)

    packed = jnp.zeros((H + A + 4, 2 * G), jnp.float32)
    packed = packed.at[0:H, 0:G].set(w_h)
    packed = packed.at[0:H, G:2 * G].set(w_cc)
    packed = packed.at[H:H + A, 0:G].set(w_i_aux)
    packed = packed.at[H + A, 0:G].set(b_i_eff[0])
    packed = packed.at[H + A, G:2 * G].set(b_h[0])
    packed = packed.at[H + A + 1, 0:G].set(w_i_cur[0])
    packed = packed.at[H + A + 2, 0:H].set(w_out[0])
    packed = packed.at[H + A + 3, 0].set(b_out[0, 0])
    return packed


@jax.jit
def decoder_rnn_forward(auxiliary, current_pm25, hn, packed):
    """Eval-mode DecoderRNN forward. Returns pm25_pred of shape (B, T, O)."""
    B, T, A = auxiliary.shape
    H = hn.shape[-1]
    O = current_pm25.shape[-1]
    assert O == 1, "output_size == 1 assumed (VPU reduce for the output Linear)"
    G = 3 * H

    h0 = hn[0]                                               # hn[0, :, :] as in the module
    # Time-major, flattened aux: one (T*B, A) @ (A, 3H) hoisted matmul and
    # sublane-aligned per-step slices inside the kernel.
    aux_tb = jnp.transpose(auxiliary, (1, 0, 2)).reshape(T * B, A)

    flops = (2 * T * B * A * G                 # hoisted aux projection
             + T * 2 * B * H * 2 * G           # per-step widened matmul
             + T * B * 10 * G                  # gate VPU math
             + 2 * T * B * H)                  # final multiply-reduce
    transcendentals = T * B * G                # 2H sigmoids + H tanh per row per step
    nbytes = 4 * (T * B * A + B * O + B * H + int(packed.size) + T * B)
    cost = pl.CostEstimate(flops=flops, transcendentals=transcendentals,
                           bytes_accessed=nbytes)

    vmem = pl.BlockSpec(memory_space=pltpu.MemorySpace.VMEM)
    pred_tb = pl.pallas_call(
        decoder_rnn_kernel,
        out_shape=jax.ShapeDtypeStruct((T, B), jnp.float32),
        in_specs=[vmem, vmem, vmem, vmem],
        out_specs=vmem,
        cost_estimate=cost,
    )(aux_tb, current_pm25, h0, packed)

    return jnp.transpose(pred_tb)[..., None]                 # (B, T, O=1)


def reference_forward(auxiliary, current_pm25, hn, raw):
    """Pure-JAX replica of the PyTorch eval-mode forward (GRUCell + Linear)."""
    w_ih, w_hh, b_ih, b_hh, w_out, b_out = raw
    B, T, A = auxiliary.shape
    h = hn[0]
    cur = current_pm25
    preds = []
    for i in range(T):
        x = jnp.concatenate([cur, auxiliary[:, i, :]], axis=-1)
        gi = x @ w_ih.T + b_ih
        gh = h @ w_hh.T + b_hh
        i_r, i_z, i_n = jnp.split(gi, 3, axis=-1)
        h_r, h_z, h_n = jnp.split(gh, 3, axis=-1)
        r = jax.nn.sigmoid(i_r + h_r)
        z = jax.nn.sigmoid(i_z + h_z)
        n = jnp.tanh(i_n + r * h_n)
        h = (1.0 - z) * n + z * h
        out = h @ w_out.T + b_out
        preds.append(out)
        cur = out
    return jnp.stack(preds, axis=1)


def make_params(key, feature_size, hidden_size, output_size):
    """Deterministic init mirroring PyTorch GRUCell / Linear uniform(-1/sqrt(H), 1/sqrt(H))."""
    ks = jax.random.split(key, 6)
    k = 1.0 / jnp.sqrt(hidden_size)
    w_ih = jax.random.uniform(ks[0], (3 * hidden_size, feature_size), jnp.float32, -k, k)
    w_hh = jax.random.uniform(ks[1], (3 * hidden_size, hidden_size), jnp.float32, -k, k)
    b_ih = jax.random.uniform(ks[2], (3 * hidden_size,), jnp.float32, -k, k)
    b_hh = jax.random.uniform(ks[3], (3 * hidden_size,), jnp.float32, -k, k)
    w_out = jax.random.uniform(ks[4], (output_size, hidden_size), jnp.float32, -k, k)
    b_out = jax.random.uniform(ks[5], (output_size,), jnp.float32, -k, k)

    H, O = hidden_size, output_size
    w_i = w_ih.T                       # (F, 3H), columns ordered [r | z | n]
    params = {
        "w_i_aux": w_i[O:, :],         # (A, 3H)  aux rows of the input weight
        "w_i_cur": w_i[:O, :],         # (O, 3H)  current_pm25 row
        "b_i": b_ih.reshape(1, 3 * H),
        "w_h": w_hh.T,                 # (H, 3H)  packed hidden weights
        "b_h": b_hh.reshape(1, 3 * H),
        "w_out": w_out,                # (O, H) = (1, H) row form
        "b_out": b_out.reshape(1, O),
    }
    raw = (w_ih, w_hh, b_ih, b_hh, w_out, b_out)
    return params, raw


if __name__ == "__main__":
    # Shapes implied by the module: feature_size = 13 = output_size(1) + aux(12)
    B = 8                 # batch
    T = 8                 # PredictionTimePeriods
    H = 32                # hidRNN
    O = 1                 # output_size
    A = 12                # auxiliary feature dim (13 - 1)

    key = jax.random.PRNGKey(0)
    k_aux, k_cur, k_h, k_w = jax.random.split(key, 4)
    auxiliary = jax.random.normal(k_aux, (B, T, A), jnp.float32)
    current_pm25 = jax.random.normal(k_cur, (B, O), jnp.float32)
    hn = jax.random.normal(k_h, (1, B, H), jnp.float32)

    params, raw = make_params(k_w, feature_size=O + A, hidden_size=H, output_size=O)
    packed = jax.block_until_ready(pack_decoder_params(params))   # one-time packing

    pred = decoder_rnn_forward(auxiliary, current_pm25, hn, packed)
    pred = jax.block_until_ready(pred)

    ref = reference_forward(auxiliary, current_pm25, hn, raw)
    ref = jax.block_until_ready(ref)

    assert pred.shape == (B, T, O), pred.shape
    assert jnp.allclose(pred, ref, atol=1e-4, rtol=1e-4), float(jnp.max(jnp.abs(pred - ref)))

    print("KERNEL_OK")
</pallas_src>

<mosaic_0001>
module attributes {stable_mosaic.version = 11 : i64} {
  func.func @decoder_rnn_kernel(%arg0: memref<64x12xf32, #tpu.memory_space<vmem>>, %arg1: memref<8x1xf32, #tpu.memory_space<vmem>>, %arg2: memref<8x32xf32, #tpu.memory_space<vmem>>, %arg3: memref<48x192xf32, #tpu.memory_space<vmem>>, %arg4: memref<8x8xf32, #tpu.memory_space<vmem>>) attributes {dimension_semantics = [], scalar_prefetch = 0 : i64, scratch_operands = 0 : i64, tpu.core_type = #tpu.core_type<tc>} {
    %c0 = arith.constant 0 : index
    %c0_0 = arith.constant 0 : index
    %0 = vector.load %arg3[%c0, %c0_0] : memref<48x192xf32, #tpu.memory_space<vmem>>, vector<32x192xf32>
    %c32 = arith.constant 32 : index
    %c0_1 = arith.constant 0 : index
    %1 = vector.load %arg3[%c32, %c0_1] : memref<48x192xf32, #tpu.memory_space<vmem>>, vector<12x96xf32>
    %c44 = arith.constant 44 : index
    %c0_2 = arith.constant 0 : index
    %2 = vector.load %arg3[%c44, %c0_2] : memref<48x192xf32, #tpu.memory_space<vmem>>, vector<1x96xf32>
    %c44_3 = arith.constant 44 : index
    %c96 = arith.constant 96 : index
    %3 = vector.load %arg3[%c44_3, %c96] : memref<48x192xf32, #tpu.memory_space<vmem>>, vector<1x96xf32>
    %c45 = arith.constant 45 : index
    %c0_4 = arith.constant 0 : index
    %4 = vector.load %arg3[%c45, %c0_4] : memref<48x192xf32, #tpu.memory_space<vmem>>, vector<1x96xf32>
    %c46 = arith.constant 46 : index
    %c0_5 = arith.constant 0 : index
    %5 = vector.load %arg3[%c46, %c0_5] : memref<48x192xf32, #tpu.memory_space<vmem>>, vector<1x32xf32>
    %c47 = arith.constant 47 : index
    %c0_6 = arith.constant 0 : index
    %6 = vector.load %arg3[%c47, %c0_6] : memref<48x192xf32, #tpu.memory_space<vmem>>, vector<1x1xf32>
    %c0_7 = arith.constant 0 : index
    %c0_8 = arith.constant 0 : index
    %7 = vector.load %arg2[%c0_7, %c0_8] : memref<8x32xf32, #tpu.memory_space<vmem>>, vector<8x32xf32>
    %c0_9 = arith.constant 0 : index
    %c0_10 = arith.constant 0 : index
    %8 = vector.load %arg1[%c0_9, %c0_10] : memref<8x1xf32, #tpu.memory_space<vmem>>, vector<8x1xf32>
    %c0_11 = arith.constant 0 : index
    %c0_12 = arith.constant 0 : index
    %9 = vector.load %arg0[%c0_11, %c0_12] : memref<64x12xf32, #tpu.memory_space<vmem>>, vector<64x12xf32>
    %cst = arith.constant dense<0.000000e+00> : vector<64x96xf32>
    %10 = tpu.matmul %9, %1, %cst {dimension_numbers = #tpu.dot_dimension_numbers<[1], [0], [0], [1], [0, 0, 1, 1], [], []>} : vector<64x12xf32>, vector<12x96xf32>, vector<64x96xf32> -> vector<64x96xf32>
    %11 = vector.broadcast %2 : vector<1x96xf32> to vector<64x96xf32>
    %12 = arith.addf %10, %11 : vector<64x96xf32>
    %13 = vector.extract_strided_slice %12 {offsets = [0, 0], sizes = [8, 96], strides = [1, 1]} : vector<64x96xf32> to vector<8x96xf32>
    %14 = vector.broadcast %6 : vector<1x1xf32> to vector<8x1xf32>
    %15 = arith.subf %8, %14 : vector<8x1xf32>
    %16 = vector.broadcast %15 : vector<8x1xf32> to vector<8x96xf32>
    %17 = vector.broadcast %4 : vector<1x96xf32> to vector<8x96xf32>
    %18 = arith.mulf %16, %17 : vector<8x96xf32>
    %19 = arith.addf %13, %18 : vector<8x96xf32>
    %cst_13 = arith.constant dense<0.000000e+00> : vector<8x192xf32>
    %20 = tpu.matmul %7, %0, %cst_13 {dimension_numbers = #tpu.dot_dimension_numbers<[1], [0], [0], [1], [0, 0, 1, 1], [], []>} : vector<8x32xf32>, vector<32x192xf32>, vector<8x192xf32> -> vector<8x192xf32>
    %21 = vector.extract_strided_slice %20 {offsets = [0, 0], sizes = [8, 96], strides = [1, 1]} : vector<8x192xf32> to vector<8x96xf32>
    %22 = vector.broadcast %3 : vector<1x96xf32> to vector<8x96xf32>
    %23 = arith.addf %21, %22 : vector<8x96xf32>
    %24 = vector.extract_strided_slice %19 {offsets = [0, 0], sizes = [8, 64], strides = [1, 1]} : vector<8x96xf32> to vector<8x64xf32>
    %25 = vector.extract_strided_slice %23 {offsets = [0, 0], sizes = [8, 64], strides = [1, 1]} : vector<8x96xf32> to vector<8x64xf32>
    %26 = arith.addf %24, %25 : vector<8x64xf32>
    %27 = arith.negf %26 : vector<8x64xf32>
    %28 = math.exp %27 : vector<8x64xf32>
    %cst_14 = arith.constant 1.000000e+00 : f32
    %29 = vector.broadcast %cst_14 : f32 to vector<8x64xf32>
    %30 = arith.addf %29, %28 : vector<8x64xf32>
    %31 = arith.divf %29, %30 : vector<8x64xf32>
    %32 = vector.extract_strided_slice %31 {offsets = [0, 0], sizes = [8, 32], strides = [1, 1]} : vector<8x64xf32> to vector<8x32xf32>
    %33 = vector.extract_strided_slice %31 {offsets = [0, 32], sizes = [8, 32], strides = [1, 1]} : vector<8x64xf32> to vector<8x32xf32>
    %34 = vector.extract_strided_slice %19 {offsets = [0, 64], sizes = [8, 32], strides = [1, 1]} : vector<8x96xf32> to vector<8x32xf32>
    %35 = vector.extract_strided_slice %23 {offsets = [0, 64], sizes = [8, 32], strides = [1, 1]} : vector<8x96xf32> to vector<8x32xf32>
    %36 = arith.mulf %32, %35 : vector<8x32xf32>
    %37 = arith.addf %34, %36 : vector<8x32xf32>
    %38 = math.tanh %37 : vector<8x32xf32>
    %cst_15 = arith.constant 1.000000e+00 : f32
    %39 = vector.broadcast %cst_15 : f32 to vector<8x32xf32>
    %40 = arith.subf %39, %33 : vector<8x32xf32>
    %41 = arith.mulf %40, %38 : vector<8x32xf32>
    %42 = arith.mulf %33, %7 : vector<8x32xf32>
    %43 = arith.addf %41, %42 : vector<8x32xf32>
    %cst_16 = arith.constant dense<0.000000e+00> : vector<8x192xf32>
    %44 = tpu.matmul %43, %0, %cst_16 {dimension_numbers = #tpu.dot_dimension_numbers<[1], [0], [0], [1], [0, 0, 1, 1], [], []>} : vector<8x32xf32>, vector<32x192xf32>, vector<8x192xf32> -> vector<8x192xf32>
    %45 = vector.extract_strided_slice %44 {offsets = [0, 0], sizes = [8, 96], strides = [1, 1]} : vector<8x192xf32> to vector<8x96xf32>
    %46 = vector.broadcast %3 : vector<1x96xf32> to vector<8x96xf32>
    %47 = arith.addf %45, %46 : vector<8x96xf32>
    %48 = vector.extract_strided_slice %12 {offsets = [8, 0], sizes = [8, 96], strides = [1, 1]} : vector<64x96xf32> to vector<8x96xf32>
    %49 = vector.extract_strided_slice %44 {offsets = [0, 96], sizes = [8, 96], strides = [1, 1]} : vector<8x192xf32> to vector<8x96xf32>
    %50 = arith.addf %48, %49 : vector<8x96xf32>
    %51 = vector.extract_strided_slice %50 {offsets = [0, 0], sizes = [8, 64], strides = [1, 1]} : vector<8x96xf32> to vector<8x64xf32>
    %52 = vector.extract_strided_slice %47 {offsets = [0, 0], sizes = [8, 64], strides = [1, 1]} : vector<8x96xf32> to vector<8x64xf32>
    %53 = arith.addf %51, %52 : vector<8x64xf32>
    %54 = arith.negf %53 : vector<8x64xf32>
    %55 = math.exp %54 : vector<8x64xf32>
    %cst_17 = arith.constant 1.000000e+00 : f32
    %56 = vector.broadcast %cst_17 : f32 to vector<8x64xf32>
    %57 = arith.addf %56, %55 : vector<8x64xf32>
    %58 = arith.divf %56, %57 : vector<8x64xf32>
    %59 = vector.extract_strided_slice %58 {offsets = [0, 0], sizes = [8, 32], strides = [1, 1]} : vector<8x64xf32> to vector<8x32xf32>
    %60 = vector.extract_strided_slice %58 {offsets = [0, 32], sizes = [8, 32], strides = [1, 1]} : vector<8x64xf32> to vector<8x32xf32>
    %61 = vector.extract_strided_slice %50 {offsets = [0, 64], sizes = [8, 32], strides = [1, 1]} : vector<8x96xf32> to vector<8x32xf32>
    %62 = vector.extract_strided_slice %47 {offsets = [0, 64], sizes = [8, 32], strides = [1, 1]} : vector<8x96xf32> to vector<8x32xf32>
    %63 = arith.mulf %59, %62 : vector<8x32xf32>
    %64 = arith.addf %61, %63 : vector<8x32xf32>
    %65 = math.tanh %64 : vector<8x32xf32>
    %cst_18 = arith.constant 1.000000e+00 : f32
    %66 = vector.broadcast %cst_18 : f32 to vector<8x32xf32>
    %67 = arith.subf %66, %60 : vector<8x32xf32>
    %68 = arith.mulf %67, %65 : vector<8x32xf32>
    %69 = arith.mulf %60, %43 : vector<8x32xf32>
    %70 = arith.addf %68, %69 : vector<8x32xf32>
    %cst_19 = arith.constant dense<0.000000e+00> : vector<8x192xf32>
    %71 = tpu.matmul %70, %0, %cst_19 {dimension_numbers = #tpu.dot_dimension_numbers<[1], [0], [0], [1], [0, 0, 1, 1], [], []>} : vector<8x32xf32>, vector<32x192xf32>, vector<8x192xf32> -> vector<8x192xf32>
    %72 = vector.extract_strided_slice %71 {offsets = [0, 0], sizes = [8, 96], strides = [1, 1]} : vector<8x192xf32> to vector<8x96xf32>
    %73 = vector.broadcast %3 : vector<1x96xf32> to vector<8x96xf32>
    %74 = arith.addf %72, %73 : vector<8x96xf32>
    %75 = vector.extract_strided_slice %12 {offsets = [16, 0], sizes = [8, 96], strides = [1, 1]} : vector<64x96xf32> to vector<8x96xf32>
    %76 = vector.extract_strided_slice %71 {offsets = [0, 96], sizes = [8, 96], strides = [1, 1]} : vector<8x192xf32> to vector<8x96xf32>
    %77 = arith.addf %75, %76 : vector<8x96xf32>
    %78 = vector.extract_strided_slice %77 {offsets = [0, 0], sizes = [8, 64], strides = [1, 1]} : vector<8x96xf32> to vector<8x64xf32>
    %79 = vector.extract_strided_slice %74 {offsets = [0, 0], sizes = [8, 64], strides = [1, 1]} : vector<8x96xf32> to vector<8x64xf32>
    %80 = arith.addf %78, %79 : vector<8x64xf32>
    %81 = arith.negf %80 : vector<8x64xf32>
    %82 = math.exp %81 : vector<8x64xf32>
    %cst_20 = arith.constant 1.000000e+00 : f32
    %83 = vector.broadcast %cst_20 : f32 to vector<8x64xf32>
    %84 = arith.addf %83, %82 : vector<8x64xf32>
    %85 = arith.divf %83, %84 : vector<8x64xf32>
    %86 = vector.extract_strided_slice %85 {offsets = [0, 0], sizes = [8, 32], strides = [1, 1]} : vector<8x64xf32> to vector<8x32xf32>
    %87 = vector.extract_strided_slice %85 {offsets = [0, 32], sizes = [8, 32], strides = [1, 1]} : vector<8x64xf32> to vector<8x32xf32>
    %88 = vector.extract_strided_slice %77 {offsets = [0, 64], sizes = [8, 32], strides = [1, 1]} : vector<8x96xf32> to vector<8x32xf32>
    %89 = vector.extract_strided_slice %74 {offsets = [0, 64], sizes = [8, 32], strides = [1, 1]} : vector<8x96xf32> to vector<8x32xf32>
    %90 = arith.mulf %86, %89 : vector<8x32xf32>
    %91 = arith.addf %88, %90 : vector<8x32xf32>
    %92 = math.tanh %91 : vector<8x32xf32>
    %cst_21 = arith.constant 1.000000e+00 : f32
    %93 = vector.broadcast %cst_21 : f32 to vector<8x32xf32>
    %94 = arith.subf %93, %87 : vector<8x32xf32>
    %95 = arith.mulf %94, %92 : vector<8x32xf32>
    %96 = arith.mulf %87, %70 : vector<8x32xf32>
    %97 = arith.addf %95, %96 : vector<8x32xf32>
    %cst_22 = arith.constant dense<0.000000e+00> : vector<8x192xf32>
    %98 = tpu.matmul %97, %0, %cst_22 {dimension_numbers = #tpu.dot_dimension_numbers<[1], [0], [0], [1], [0, 0, 1, 1], [], []>} : vector<8x32xf32>, vector<32x192xf32>, vector<8x192xf32> -> vector<8x192xf32>
    %99 = vector.extract_strided_slice %98 {offsets = [0, 0], sizes = [8, 96], strides = [1, 1]} : vector<8x192xf32> to vector<8x96xf32>
    %100 = vector.broadcast %3 : vector<1x96xf32> to vector<8x96xf32>
    %101 = arith.addf %99, %100 : vector<8x96xf32>
    %102 = vector.extract_strided_slice %12 {offsets = [24, 0], sizes = [8, 96], strides = [1, 1]} : vector<64x96xf32> to vector<8x96xf32>
    %103 = vector.extract_strided_slice %98 {offsets = [0, 96], sizes = [8, 96], strides = [1, 1]} : vector<8x192xf32> to vector<8x96xf32>
    %104 = arith.addf %102, %103 : vector<8x96xf32>
    %105 = vector.extract_strided_slice %104 {offsets = [0, 0], sizes = [8, 64], strides = [1, 1]} : vector<8x96xf32> to vector<8x64xf32>
    %106 = vector.extract_strided_slice %101 {offsets = [0, 0], sizes = [8, 64], strides = [1, 1]} : vector<8x96xf32> to vector<8x64xf32>
    %107 = arith.addf %105, %106 : vector<8x64xf32>
    %108 = arith.negf %107 : vector<8x64xf32>
    %109 = math.exp %108 : vector<8x64xf32>
    %cst_23 = arith.constant 1.000000e+00 : f32
    %110 = vector.broadcast %cst_23 : f32 to vector<8x64xf32>
    %111 = arith.addf %110, %109 : vector<8x64xf32>
    %112 = arith.divf %110, %111 : vector<8x64xf32>
    %113 = vector.extract_strided_slice %112 {offsets = [0, 0], sizes = [8, 32], strides = [1, 1]} : vector<8x64xf32> to vector<8x32xf32>
    %114 = vector.extract_strided_slice %112 {offsets = [0, 32], sizes = [8, 32], strides = [1, 1]} : vector<8x64xf32> to vector<8x32xf32>
    %115 = vector.extract_strided_slice %104 {offsets = [0, 64], sizes = [8, 32], strides = [1, 1]} : vector<8x96xf32> to vector<8x32xf32>
    %116 = vector.extract_strided_slice %101 {offsets = [0, 64], sizes = [8, 32], strides = [1, 1]} : vector<8x96xf32> to vector<8x32xf32>
    %117 = arith.mulf %113, %116 : vector<8x32xf32>
    %118 = arith.addf %115, %117 : vector<8x32xf32>
    %119 = math.tanh %118 : vector<8x32xf32>
    %cst_24 = arith.constant 1.000000e+00 : f32
    %120 = vector.broadcast %cst_24 : f32 to vector<8x32xf32>
    %121 = arith.subf %120, %114 : vector<8x32xf32>
    %122 = arith.mulf %121, %119 : vector<8x32xf32>
    %123 = arith.mulf %114, %97 : vector<8x32xf32>
    %124 = arith.addf %122, %123 : vector<8x32xf32>
    %cst_25 = arith.constant dense<0.000000e+00> : vector<8x192xf32>
    %125 = tpu.matmul %124, %0, %cst_25 {dimension_numbers = #tpu.dot_dimension_numbers<[1], [0], [0], [1], [0, 0, 1, 1], [], []>} : vector<8x32xf32>, vector<32x192xf32>, vector<8x192xf32> -> vector<8x192xf32>
    %126 = vector.extract_strided_slice %125 {offsets = [0, 0], sizes = [8, 96], strides = [1, 1]} : vector<8x192xf32> to vector<8x96xf32>
    %127 = vector.broadcast %3 : vector<1x96xf32> to vector<8x96xf32>
    %128 = arith.addf %126, %127 : vector<8x96xf32>
    %129 = vector.extract_strided_slice %12 {offsets = [32, 0], sizes = [8, 96], strides = [1, 1]} : vector<64x96xf32> to vector<8x96xf32>
    %130 = vector.extract_strided_slice %125 {offsets = [0, 96], sizes = [8, 96], strides = [1, 1]} : vector<8x192xf32> to vector<8x96xf32>
    %131 = arith.addf %129, %130 : vector<8x96xf32>
    %132 = vector.extract_strided_slice %131 {offsets = [0, 0], sizes = [8, 64], strides = [1, 1]} : vector<8x96xf32> to vector<8x64xf32>
    %133 = vector.extract_strided_slice %128 {offsets = [0, 0], sizes = [8, 64], strides = [1, 1]} : vector<8x96xf32> to vector<8x64xf32>
    %134 = arith.addf %132, %133 : vector<8x64xf32>
    %135 = arith.negf %134 : vector<8x64xf32>
    %136 = math.exp %135 : vector<8x64xf32>
    %cst_26 = arith.constant 1.000000e+00 : f32
    %137 = vector.broadcast %cst_26 : f32 to vector<8x64xf32>
    %138 = arith.addf %137, %136 : vector<8x64xf32>
    %139 = arith.divf %137, %138 : vector<8x64xf32>
    %140 = vector.extract_strided_slice %139 {offsets = [0, 0], sizes = [8, 32], strides = [1, 1]} : vector<8x64xf32> to vector<8x32xf32>
    %141 = vector.extract_strided_slice %139 {offsets = [0, 32], sizes = [8, 32], strides = [1, 1]} : vector<8x64xf32> to vector<8x32xf32>
    %142 = vector.extract_strided_slice %131 {offsets = [0, 64], sizes = [8, 32], strides = [1, 1]} : vector<8x96xf32> to vector<8x32xf32>
    %143 = vector.extract_strided_slice %128 {offsets = [0, 64], sizes = [8, 32], strides = [1, 1]} : vector<8x96xf32> to vector<8x32xf32>
    %144 = arith.mulf %140, %143 : vector<8x32xf32>
    %145 = arith.addf %142, %144 : vector<8x32xf32>
    %146 = math.tanh %145 : vector<8x32xf32>
    %cst_27 = arith.constant 1.000000e+00 : f32
    %147 = vector.broadcast %cst_27 : f32 to vector<8x32xf32>
    %148 = arith.subf %147, %141 : vector<8x32xf32>
    %149 = arith.mulf %148, %146 : vector<8x32xf32>
    %150 = arith.mulf %141, %124 : vector<8x32xf32>
    %151 = arith.addf %149, %150 : vector<8x32xf32>
    %cst_28 = arith.constant dense<0.000000e+00> : vector<8x192xf32>
    %152 = tpu.matmul %151, %0, %cst_28 {dimension_numbers = #tpu.dot_dimension_numbers<[1], [0], [0], [1], [0, 0, 1, 1], [], []>} : vector<8x32xf32>, vector<32x192xf32>, vector<8x192xf32> -> vector<8x192xf32>
    %153 = vector.extract_strided_slice %152 {offsets = [0, 0], sizes = [8, 96], strides = [1, 1]} : vector<8x192xf32> to vector<8x96xf32>
    %154 = vector.broadcast %3 : vector<1x96xf32> to vector<8x96xf32>
    %155 = arith.addf %153, %154 : vector<8x96xf32>
    %156 = vector.extract_strided_slice %12 {offsets = [40, 0], sizes = [8, 96], strides = [1, 1]} : vector<64x96xf32> to vector<8x96xf32>
    %157 = vector.extract_strided_slice %152 {offsets = [0, 96], sizes = [8, 96], strides = [1, 1]} : vector<8x192xf32> to vector<8x96xf32>
    %158 = arith.addf %156, %157 : vector<8x96xf32>
    %159 = vector.extract_strided_slice %158 {offsets = [0, 0], sizes = [8, 64], strides = [1, 1]} : vector<8x96xf32> to vector<8x64xf32>
    %160 = vector.extract_strided_slice %155 {offsets = [0, 0], sizes = [8, 64], strides = [1, 1]} : vector<8x96xf32> to vector<8x64xf32>
    %161 = arith.addf %159, %160 : vector<8x64xf32>
    %162 = arith.negf %161 : vector<8x64xf32>
    %163 = math.exp %162 : vector<8x64xf32>
    %cst_29 = arith.constant 1.000000e+00 : f32
    %164 = vector.broadcast %cst_29 : f32 to vector<8x64xf32>
    %165 = arith.addf %164, %163 : vector<8x64xf32>
    %166 = arith.divf %164, %165 : vector<8x64xf32>
    %167 = vector.extract_strided_slice %166 {offsets = [0, 0], sizes = [8, 32], strides = [1, 1]} : vector<8x64xf32> to vector<8x32xf32>
    %168 = vector.extract_strided_slice %166 {offsets = [0, 32], sizes = [8, 32], strides = [1, 1]} : vector<8x64xf32> to vector<8x32xf32>
    %169 = vector.extract_strided_slice %158 {offsets = [0, 64], sizes = [8, 32], strides = [1, 1]} : vector<8x96xf32> to vector<8x32xf32>
    %170 = vector.extract_strided_slice %155 {offsets = [0, 64], sizes = [8, 32], strides = [1, 1]} : vector<8x96xf32> to vector<8x32xf32>
    %171 = arith.mulf %167, %170 : vector<8x32xf32>
    %172 = arith.addf %169, %171 : vector<8x32xf32>
    %173 = math.tanh %172 : vector<8x32xf32>
    %cst_30 = arith.constant 1.000000e+00 : f32
    %174 = vector.broadcast %cst_30 : f32 to vector<8x32xf32>
    %175 = arith.subf %174, %168 : vector<8x32xf32>
    %176 = arith.mulf %175, %173 : vector<8x32xf32>
    %177 = arith.mulf %168, %151 : vector<8x32xf32>
    %178 = arith.addf %176, %177 : vector<8x32xf32>
    %cst_31 = arith.constant dense<0.000000e+00> : vector<8x192xf32>
    %179 = tpu.matmul %178, %0, %cst_31 {dimension_numbers = #tpu.dot_dimension_numbers<[1], [0], [0], [1], [0, 0, 1, 1], [], []>} : vector<8x32xf32>, vector<32x192xf32>, vector<8x192xf32> -> vector<8x192xf32>
    %180 = vector.extract_strided_slice %179 {offsets = [0, 0], sizes = [8, 96], strides = [1, 1]} : vector<8x192xf32> to vector<8x96xf32>
    %181 = vector.broadcast %3 : vector<1x96xf32> to vector<8x96xf32>
    %182 = arith.addf %180, %181 : vector<8x96xf32>
    %183 = vector.extract_strided_slice %12 {offsets = [48, 0], sizes = [8, 96], strides = [1, 1]} : vector<64x96xf32> to vector<8x96xf32>
    %184 = vector.extract_strided_slice %179 {offsets = [0, 96], sizes = [8, 96], strides = [1, 1]} : vector<8x192xf32> to vector<8x96xf32>
    %185 = arith.addf %183, %184 : vector<8x96xf32>
    %186 = vector.extract_strided_slice %185 {offsets = [0, 0], sizes = [8, 64], strides = [1, 1]} : vector<8x96xf32> to vector<8x64xf32>
    %187 = vector.extract_strided_slice %182 {offsets = [0, 0], sizes = [8, 64], strides = [1, 1]} : vector<8x96xf32> to vector<8x64xf32>
    %188 = arith.addf %186, %187 : vector<8x64xf32>
    %189 = arith.negf %188 : vector<8x64xf32>
    %190 = math.exp %189 : vector<8x64xf32>
    %cst_32 = arith.constant 1.000000e+00 : f32
    %191 = vector.broadcast %cst_32 : f32 to vector<8x64xf32>
    %192 = arith.addf %191, %190 : vector<8x64xf32>
    %193 = arith.divf %191, %192 : vector<8x64xf32>
    %194 = vector.extract_strided_slice %193 {offsets = [0, 0], sizes = [8, 32], strides = [1, 1]} : vector<8x64xf32> to vector<8x32xf32>
    %195 = vector.extract_strided_slice %193 {offsets = [0, 32], sizes = [8, 32], strides = [1, 1]} : vector<8x64xf32> to vector<8x32xf32>
    %196 = vector.extract_strided_slice %185 {offsets = [0, 64], sizes = [8, 32], strides = [1, 1]} : vector<8x96xf32> to vector<8x32xf32>
    %197 = vector.extract_strided_slice %182 {offsets = [0, 64], sizes = [8, 32], strides = [1, 1]} : vector<8x96xf32> to vector<8x32xf32>
    %198 = arith.mulf %194, %197 : vector<8x32xf32>
    %199 = arith.addf %196, %198 : vector<8x32xf32>
    %200 = math.tanh %199 : vector<8x32xf32>
    %cst_33 = arith.constant 1.000000e+00 : f32
    %201 = vector.broadcast %cst_33 : f32 to vector<8x32xf32>
    %202 = arith.subf %201, %195 : vector<8x32xf32>
    %203 = arith.mulf %202, %200 : vector<8x32xf32>
    %204 = arith.mulf %195, %178 : vector<8x32xf32>
    %205 = arith.addf %203, %204 : vector<8x32xf32>
    %cst_34 = arith.constant dense<0.000000e+00> : vector<8x192xf32>
    %206 = tpu.matmul %205, %0, %cst_34 {dimension_numbers = #tpu.dot_dimension_numbers<[1], [0], [0], [1], [0, 0, 1, 1], [], []>} : vector<8x32xf32>, vector<32x192xf32>, vector<8x192xf32> -> vector<8x192xf32>
    %207 = vector.extract_strided_slice %206 {offsets = [0, 0], sizes = [8, 96], strides = [1, 1]} : vector<8x192xf32> to vector<8x96xf32>
    %208 = vector.broadcast %3 : vector<1x96xf32> to vector<8x96xf32>
    %209 = arith.addf %207, %208 : vector<8x96xf32>
    %210 = vector.extract_strided_slice %12 {offsets = [56, 0], sizes = [8, 96], strides = [1, 1]} : vector<64x96xf32> to vector<8x96xf32>
    %211 = vector.extract_strided_slice %206 {offsets = [0, 96], sizes = [8, 96], strides = [1, 1]} : vector<8x192xf32> to vector<8x96xf32>
    %212 = arith.addf %210, %211 : vector<8x96xf32>
    %213 = vector.extract_strided_slice %212 {offsets = [0, 0], sizes = [8, 64], strides = [1, 1]} : vector<8x96xf32> to vector<8x64xf32>
    %214 = vector.extract_strided_slice %209 {offsets = [0, 0], sizes = [8, 64], strides = [1, 1]} : vector<8x96xf32> to vector<8x64xf32>
    %215 = arith.addf %213, %214 : vector<8x64xf32>
    %216 = arith.negf %215 : vector<8x64xf32>
    %217 = math.exp %216 : vector<8x64xf32>
    %cst_35 = arith.constant 1.000000e+00 : f32
    %218 = vector.broadcast %cst_35 : f32 to vector<8x64xf32>
    %219 = arith.addf %218, %217 : vector<8x64xf32>
    %220 = arith.divf %218, %219 : vector<8x64xf32>
    %221 = vector.extract_strided_slice %220 {offsets = [0, 0], sizes = [8, 32], strides = [1, 1]} : vector<8x64xf32> to vector<8x32xf32>
    %222 = vector.extract_strided_slice %220 {offsets = [0, 32], sizes = [8, 32], strides = [1, 1]} : vector<8x64xf32> to vector<8x32xf32>
    %223 = vector.extract_strided_slice %212 {offsets = [0, 64], sizes = [8, 32], strides = [1, 1]} : vector<8x96xf32> to vector<8x32xf32>
    %224 = vector.extract_strided_slice %209 {offsets = [0, 64], sizes = [8, 32], strides = [1, 1]} : vector<8x96xf32> to vector<8x32xf32>
    %225 = arith.mulf %221, %224 : vector<8x32xf32>
    %226 = arith.addf %223, %225 : vector<8x32xf32>
    %227 = math.tanh %226 : vector<8x32xf32>
    %cst_36 = arith.constant 1.000000e+00 : f32
    %228 = vector.broadcast %cst_36 : f32 to vector<8x32xf32>
    %229 = arith.subf %228, %222 : vector<8x32xf32>
    %230 = arith.mulf %229, %227 : vector<8x32xf32>
    %231 = arith.mulf %222, %205 : vector<8x32xf32>
    %232 = arith.addf %230, %231 : vector<8x32xf32>
    %233 = vector.shape_cast %43 : vector<8x32xf32> to vector<1x8x32xf32>
    %234 = vector.shape_cast %70 : vector<8x32xf32> to vector<1x8x32xf32>
    %235 = vector.shape_cast %97 : vector<8x32xf32> to vector<1x8x32xf32>
    %236 = vector.shape_cast %124 : vector<8x32xf32> to vector<1x8x32xf32>
    %237 = vector.shape_cast %151 : vector<8x32xf32> to vector<1x8x32xf32>
    %238 = vector.shape_cast %178 : vector<8x32xf32> to vector<1x8x32xf32>
    %239 = vector.shape_cast %205 : vector<8x32xf32> to vector<1x8x32xf32>
    %240 = vector.shape_cast %232 : vector<8x32xf32> to vector<1x8x32xf32>
    %241 = tpu.concatenate %233, %234, %235, %236, %237, %238, %239, %240 in 0 : vector<1x8x32xf32>, vector<1x8x32xf32>, vector<1x8x32xf32>, vector<1x8x32xf32>, vector<1x8x32xf32>, vector<1x8x32xf32>, vector<1x8x32xf32>, vector<1x8x32xf32> -> vector<8x8x32xf32>
    %242 = vector.shape_cast %5 : vector<1x32xf32> to vector<1x1x32xf32>
    %243 = vector.broadcast %242 : vector<1x1x32xf32> to vector<8x8x32xf32>
    %244 = arith.mulf %241, %243 : vector<8x8x32xf32>
    %cst_37 = arith.constant dense<0.000000e+00> : vector<8x8xf32>
    %245 = vector.multi_reduction <add>, %244, %cst_37 [2] : vector<8x8x32xf32> to vector<8x8xf32>
    %246 = vector.broadcast %6 : vector<1x1xf32> to vector<8x8xf32>
    %247 = arith.addf %245, %246 : vector<8x8xf32>
    %c0_38 = arith.constant 0 : index
    %c0_39 = arith.constant 0 : index
    %248 = vector.load %arg4[%c0_38, %c0_39] : memref<8x8xf32, #tpu.memory_space<vmem>>, vector<8x8xf32>
    tpu.vector_store %arg4[%c0_38, %c0_39], %247 {strides = array<i32>} : memref<8x8xf32, #tpu.memory_space<vmem>>, vector<8x8xf32>,
    return
  }
}

</mosaic_0001>

<bundles_post_ra>
// kernel: decoder_rnn_forward.1
= control target key start
LH: loop header
LB: loop body
LE: loop exit
PB: predicated region body
PF: predicated region fallthrough
CT: control target
= control target key end

     0   :  { %vm67_vm0 = vcmask 1043456   ;;  %v1330_v3 = vmov 0.0   ;;  %vm42_vm1 = vcmask 97280   ;;  %v1331_v17 = vmov 0   ;;  %s1332_s20 = smov 32   ;;  %s1334_s25 = smov 96   ;;  %s1682_s3 = inlined_call_operand.vmem [shape: f32[48,192], index: 3, kind: input, shape index: {}]   ;;  %s1683_s0 = inlined_call_operand.vmem [shape: f32[64,12], index: 0, kind: input, shape index: {}]   ;;  %s1684_s1 = inlined_call_operand.vmem [shape: f32[8,1], index: 1, kind: input, shape index: {}]   ;;  %s1685_s2 = inlined_call_operand.vmem [shape: f32[8,32], index: 2, kind: input, shape index: {}]   ;;  %s1686_s4 = inlined_call_operand.vmem [shape: f32[8,8], index: 4, kind: output, shape index: {}]  }
   0x1   :  { %v26_v0 = vld [vmem:[%s1682_s3 + $0x50] sm:$0xf]  ;;  %v1366_v1 = vld [vmem:[%s1682_s3 + $0x38] sm:$0xff]  ;;  %252 = vmatprep.mubr.f32.mxu1 %v1330_v3  ;;  %v25_v4 = vld [vmem:[%s1682_s3 + $0x40] sm:$0xff]  ;;  %1280 = vset.pattern.permute.xlu1 %v1331_v17  ;;  %vm184_vm2 = vcmask 261120   ;;  %vm1203_vm3 = vcmask 1041409  }
   0x2   :  { %v1371_v2 = vld [vmem:[%s1682_s3 + $0x30] sm:$0xff]  ;;  %1259 = vmatprep.subr.msk.mxu0 %vm67_vm0, %v26_v0  ;;  %212 = vmatprep.subr.mxu1 %v1366_v1  ;;  %v1381_v5 = vld [vmem:[%s1682_s3 + $0x28] sm:$0xff]  ;;  %v34_v6 = vld [vmem:[%s1683_s0] sm:$0xff]  ;;  %vm1205_vm4 = vcmask 1042434   ;;  %vm1207_vm5 = vcmask 1043459   ;;  %vm1209_vm6 = vcmask 1044484  }
   0x3   :  { %1260 = vmatpush3.msk.msra.mxu0 %vm67_vm0, %v26_v0  ;;  %213 = vmatpush1.msra.mxu1 %v1371_v2  ;;  %v1390_v7 = vld [vmem:[%s1682_s3 + $0x20] sm:$0xff]  ;;  %v35_v8 = vld [vmem:[%s1683_s0 + $0x8] sm:$0xff]  ;;  %v1399_v9 = vld [vmem:[%s1682_s3 + $0x18] sm:$0xff]  ;;  %vm1211_vm7 = vcmask 1045509   ;;  %vm1213_vm8 = vcmask 1046534   ;;  %vm1215_vm9 = vcmask 1047559  }
   0x4   :  { %1261 = vmatprep.subr.mxu0 %v25_v4  ;;  %214 = vmatprep.subr.mxu1 %v1381_v5  ;;  %v1405_v10 = vld [vmem:[%s1682_s3 + $0x10] sm:$0xff]  ;;  %v33_v12 = vld [vmem:[%s1684_s1] sm:$0xff]  ;;  %v1420_v13 = vld [vmem:[%s1682_s3 + $0x8] sm:$0xff]  ;;  %vm1218_vm10 = vcmask 64512  }
   0x5   :  { %1262 = vmatpush3.msra.mxu0 %v25_v4  ;;  %1263 = vmatprep.mubr.msk.f32.mxu0 %vm42_vm1, %v34_v6  ;;  %v1410_v11 = vld [vmem:[%s1682_s3 + $0x57] ss:$0 sm:$0xff]  ;;  %v1426_v15 = vld [vmem:[%s1682_s3 + $0x54] ss:$0 sm:$0xff]  ;;  %v1432_v16 = vld [vmem:[%s1682_s3] sm:$0xff] }
   0x6   :  { %215 = vmatpush1.msra.mxu1 %v1390_v7  ;;  %1264 = vmatmul.mubr.msk.f32.vlgmr.msra.gmra.mxu0 %vm42_vm1, %v35_v8  ;;  %v176_v14 = vsub.f32 %v33_v12, %v1410_v11  ;;  %v32_v18 = vld [vmem:[%s1685_s2] sm:$0xff]  ;;  %v28_v19 = vld [vmem:[%s1682_s3 + $0x5c] ss:$0 sm:$0xff]  ;;  %s1333_s2 = smov 64   ;;  %v29_v27 = vld [vmem:[%s1682_s3 + $0x55] ss:$0 sm:$0xff] }
   0x7   :  { %216 = vmatprep.subr.mxu1 %v1399_v9  ;;  %260 = vrot.lane.b32.xlu0 %v1426_v15, %s1332_s20  ;;  %v36_v8 = vld [vmem:[%s1683_s0 + $0x10] sm:$0xff]  ;;  %v37_v12 = vld [vmem:[%s1683_s0 + $0x18] sm:$0xff] }
   0x8   :  { %217 = vmatpush1.msra.mxu1 %v1405_v10  ;;  %179 = vperm.xlu1 %1280, %v176_v14   ;;  %v38_v14 = vld [vmem:[%s1683_s0 + $0x20] sm:$0xff] }
   0x9   :  { %218 = vmatprep.subr.mxu1 %v1420_v13  ;;  %437 = vmatprep.subr.mxu0 %v1366_v1 }
   0xa   :  { %219 = vmatpush1.msra.mxu1 %v1432_v16  ;;  %438 = vmatpush1.msra.mxu0 %v1371_v2 }
   0xb   :  { %1233 = vmatmul.mubr.msk.f32.vlgmr.msra.gmra.mxu1 %vm184_vm2, %v32_v18  ;;  %325 = vmatprep.subr.mxu1 %v1366_v1 }
   0xc   :  { %326 = vmatpush1.msra.mxu1 %v1371_v2  ;;  %365 = vmatprep.mubr.f32.mxu1 %v1330_v3 }
   0xd   :  { %262 = vrot.lane.b32.xlu0 %v28_v19, %s1332_s20  ;;  %327 = vmatprep.subr.mxu1 %v1381_v5  ;;  %v41_v19 = vld [vmem:[%s1683_s0 + $0x38] sm:$0xff] }
   0xe   :  { %328 = vmatpush1.msra.mxu1 %v1390_v7  ;;  %439 = vmatprep.subr.mxu0 %v1381_v5 }
   0xf   :  { %329 = vmatprep.subr.mxu1 %v1399_v9  ;;  %440 = vmatpush1.msra.mxu0 %v1390_v7 }
  0x10   :  { %330 = vmatpush1.msra.mxu1 %v1405_v10  ;;  %441 = vmatprep.subr.mxu0 %v1399_v9 }
  0x11   :  { %331 = vmatprep.subr.mxu1 %v1420_v13  ;;  %442 = vmatpush1.msra.mxu0 %v1405_v10 }
  0x12   :  { %332 = vmatpush1.msra.mxu1 %v1432_v16  ;;  %443 = vmatprep.subr.mxu0 %v1420_v13 }
  0x13   :  { %549 = vmatprep.subr.mxu1 %v1366_v1  ;;  %444 = vmatpush1.msra.mxu0 %v1432_v16 }
  0x14   :  { %1281 = vset.pattern.permute.xlu0 %v1331_v17  ;;  %661 = vmatprep.subr.mxu0 %v1366_v1  ;;  %v39_v17 = vld [vmem:[%s1683_s0 + $0x28] sm:$0xff] }
  0x15   :  { %1266 = vmatprep.mubr.msk.f32.mxu0 %vm42_vm1, %v36_v8 }
  0x16   :  { %1267 = vmatmul.mubr.msk.f32.gmra.mxu0 %vm42_vm1, %v37_v12 }
  0x17   :  { %1269 = vmatprep.mubr.msk.f32.mxu0 %vm42_vm1, %v38_v14 }
  0x1a   :  { %1270 = vmatmul.mubr.msk.f32.gmra.mxu0 %vm42_vm1, %v39_v17 }
  0x79   :  { %v261_v20 = vpop.permute.xlu0 %260 }
  0x7f   :  { %v263_v21 = vpop.permute.xlu0 %262 }
  0x80   :  { %v1467_v22 = vsel %vm184_vm2, %v261_v20, %v263_v21 }
  0x83   :  { %v180_v28 = vpop.permute.xlu1 %179 }
  0x84   :  { %v182_v30 = vmul.f32 %v180_v28, %v29_v27 }
  0xc6   :  { %v1265_v26 = vpop.f32.mrf.mxu0 }
  0xc7   :  { %v143_v53 = vadd.f32 %v1265_v26, %v1426_v15 }
  0xc8   :  { %v137_v29 = vpop.f32.mrf.mxu0 }
  0xc9   :  { %v138_v31 = vadd.f32 %v137_v29, %v1426_v15 }
  0xcb   :  { %v254_v23 = vpop.f32.mrf.mxu1  ;;  %v183_v32 = vadd.f32 %v182_v30, %v138_v31 }
  0xcc   :  { %v266_v24 = vadd.f32 %v1467_v22, %v254_v23 }
  0xcd   :  { %v256_v25 = vpop.f32.mrf.mxu1 }
  0xce   :  { %275 = vrot.lane.b32.xlu1 %v266_v24, %s1333_s2  ;;  %v267_v33 = vadd.f32 %v266_v24, %v183_v32 }
  0xd0   :  { %v1234_v34 = vmul.f32 -1.442695, %v267_v33 }
  0xd2   :  { %1282 = vpow2.f32 %v1234_v34 }
  0xd6   :  { %v1268_v28 = vpop.f32.mrf.mxu0 }
  0xd8   :  { %v147_v29 = vpop.f32.mrf.mxu0 }
  0xda   :  { %v1540_v30 = vpop.f32.mrf.mxu0 }
  0xdc   :  { %v1542_v31 = vpop.f32.mrf.mxu0 }
  0xdf   :  { %v1283_v35 = vpop.eup %1282 }
  0xe0   :  { %v271_v36 = vadd.f32 1.0, %v1283_v35 }
  0xe2   :  { %1284 = vrcp.f32 %v271_v36 }
  0xef   :  { %v1285_v37 = vpop.eup %1284 }
  0xf0   :  { %v285_v44 = vsub.f32 1.0, %v1285_v37 }
 0x140   :  { %v276_v38 = vpop.permute.xlu1 %275 }
 0x141   :  { %v278_v39 = vmul.f32 %v1285_v37, %v276_v38 }
 0x143   :  { %280 = vrot.lane.b32.xlu0 %v278_v39, %s1333_s2 }
 0x147   :  { %291 = vrot.lane.b32.xlu0 %v32_v18, %s1332_s20  ;;  %v40_v18 = vld [vmem:[%s1683_s0 + $0x30] sm:$0xff] }
 0x148   :  { %1272 = vmatprep.mubr.msk.f32.mxu0 %vm42_vm1, %v40_v18 }
 0x149   :  { %1273 = vmatmul.mubr.msk.f32.gmra.mxu0 %vm42_vm1, %v41_v19 }
 0x14a   :  { %477 = vmatprep.mubr.f32.mxu0 %v1330_v3 }
 0x1b5   :  { %v281_v40 = vpop.permute.xlu0 %280 }
 0x1b6   :  { %v283_v41 = vadd.f32 %v281_v40, %v183_v32 }
 0x1b8   :  { %1286 = vtanh.f32 %v283_v41 }
 0x1b9   :  { %v292_v43 = vpop.permute.xlu0 %291 }
 0x1ba   :  { %v294_v46 = vmul.f32 %v1285_v37, %v292_v43  ;;  %v148_v37 = vadd.f32 %v147_v29, %v1426_v15 }
 0x1c5   :  { %v1287_v42 = vpop.eup %1286 }
 0x1c6   :  { %287 = vrot.lane.b32.xlu1 %v1287_v42, %s1334_s25 }
 0x209   :  { %v1544_v32 = vpop.f32.mrf.mxu0 }
 0x20b   :  { %v1546_v33 = vpop.f32.mrf.mxu0 }
 0x238   :  { %v288_v45 = vpop.permute.xlu1 %287 }
 0x239   :  { %v290_v47 = vmul.f32 %v288_v45, %v285_v44 }
 0x23b   :  { %v1478_v48 = vadd.f32 %v294_v46, %v290_v47 }
 0x23d   :  { %297 = vrot.lane.b32.xlu1 %v1478_v48, %s1334_s25 }
 0x2af   :  { %v298_v49 = vpop.permute.xlu1 %297 }
 0x2b0   :  { %1235 = vmatmul.mubr.msk.f32.vlgmr.msra.gmra.mxu1 %vm184_vm2, %v298_v49 }
 0x2b1   :  { %550 = vmatpush1.msra.mxu1 %v1371_v2  ;;  %589 = vmatprep.mubr.f32.mxu1 %v1330_v3 }
 0x2b2   :  { %551 = vmatprep.subr.mxu1 %v1381_v5 }
 0x2b3   :  { %552 = vmatpush1.msra.mxu1 %v1390_v7 }
 0x2b4   :  { %553 = vmatprep.subr.mxu1 %v1399_v9 }
 0x2b5   :  { %554 = vmatpush1.msra.mxu1 %v1405_v10 }
 0x2b6   :  { %555 = vmatprep.subr.mxu1 %v1420_v13 }
 0x2b7   :  { %556 = vmatpush1.msra.mxu1 %v1432_v16 }
 0x2b8   :  { %773 = vmatprep.subr.mxu1 %v1366_v1 }
 0x370   :  { %v367_v50 = vpop.f32.mrf.mxu1 }
 0x371   :  { %375 = vrot.lane.b32.xlu0 %v367_v50, %s1332_s20  ;;  %v372_v52 = vadd.f32 %v367_v50, %v1467_v22 }
 0x372   :  { %v369_v51 = vpop.f32.mrf.mxu1 }
 0x373   :  { %377 = vrot.lane.b32.xlu1 %v369_v51, %s1332_s20 }
 0x375   :  { %390 = vrot.lane.b32.xlu0 %v372_v52, %s1333_s2 }
 0x3e3   :  { %v376_v54 = vpop.permute.xlu0 %375 }
 0x3e5   :  { %v378_v55 = vpop.permute.xlu1 %377 }
 0x3e6   :  { %v379_v56 = vsel %vm184_vm2, %v376_v54, %v378_v55 }
 0x3e7   :  { %v381_v57 = vadd.f32 %v379_v56, %v143_v53  ;;  %v391_v63 = vpop.permute.xlu0 %390 }
 0x3e9   :  { %v382_v58 = vadd.f32 %v381_v57, %v372_v52 }
 0x3eb   :  { %v1236_v59 = vmul.f32 -1.442695, %v382_v58 }
 0x3ed   :  { %1288 = vpow2.f32 %v1236_v59 }
 0x3fa   :  { %v1289_v60 = vpop.eup %1288 }
 0x3fb   :  { %v386_v61 = vadd.f32 1.0, %v1289_v60 }
 0x3fd   :  { %1290 = vrcp.f32 %v386_v61 }
 0x40a   :  { %v1291_v62 = vpop.eup %1290 }
 0x40b   :  { %v393_v0 = vmul.f32 %v1291_v62, %v391_v63  ;;  %v400_v21 = vsub.f32 1.0, %v1291_v62  ;;  %v406_v24 = vmul.f32 %v1291_v62, %v1478_v48  ;;  %v153_v62 = vadd.f32 %v1268_v28, %v1426_v15 }
 0x40d   :  { %395 = vrot.lane.b32.xlu1 %v393_v0, %s1333_s2 }
 0x47f   :  { %v396_v4 = vpop.permute.xlu1 %395 }
 0x480   :  { %v398_v6 = vadd.f32 %v396_v4, %v381_v57 }
 0x482   :  { %1292 = vtanh.f32 %v398_v6 }
 0x48f   :  { %v1293_v20 = vpop.eup %1292 }
 0x490   :  { %402 = vrot.lane.b32.xlu0 %v1293_v20, %s1334_s25 }
 0x502   :  { %v403_v23 = vpop.permute.xlu0 %402 }
 0x503   :  { %v405_v25 = vmul.f32 %v403_v23, %v400_v21 }
 0x505   :  { %v1526_v26 = vadd.f32 %v406_v24, %v405_v25 }
 0x507   :  { %409 = vrot.lane.b32.xlu1 %v1526_v26, %s1334_s25 }
 0x579   :  { %v410_v27 = vpop.permute.xlu1 %409 }
 0x57a   :  { %1237 = vmatmul.mubr.msk.f32.vlgmr.msra.gmra.mxu0 %vm184_vm2, %v410_v27 }
 0x57b   :  { %662 = vmatpush1.msra.mxu0 %v1371_v2  ;;  %701 = vmatprep.mubr.f32.mxu0 %v1330_v3 }
 0x57c   :  { %663 = vmatprep.subr.mxu0 %v1381_v5 }
 0x57d   :  { %664 = vmatpush1.msra.mxu0 %v1390_v7 }
 0x57e   :  { %665 = vmatprep.subr.mxu0 %v1399_v9 }
 0x57f   :  { %666 = vmatpush1.msra.mxu0 %v1405_v10 }
 0x580   :  { %667 = vmatprep.subr.mxu0 %v1420_v13 }
 0x581   :  { %668 = vmatpush1.msra.mxu0 %v1432_v16 }
 0x582   :  { %885 = vmatprep.subr.mxu0 %v1366_v1 }
 0x63a   :  { %v479_v34 = vpop.f32.mrf.mxu0 }
 0x63b   :  { %487 = vrot.lane.b32.xlu0 %v479_v34, %s1332_s20  ;;  %v484_v36 = vadd.f32 %v479_v34, %v1467_v22 }
 0x63c   :  { %v481_v35 = vpop.f32.mrf.mxu0 }
 0x63d   :  { %489 = vrot.lane.b32.xlu1 %v481_v35, %s1332_s20 }
 0x63f   :  { %502 = vrot.lane.b32.xlu0 %v484_v36, %s1333_s2 }
 0x6ad   :  { %v488_v38 = vpop.permute.xlu0 %487 }
 0x6af   :  { %v490_v39 = vpop.permute.xlu1 %489 }
 0x6b0   :  { %v491_v40 = vsel %vm184_vm2, %v488_v38, %v490_v39  ;;  %v158_v38 = vadd.f32 %v1542_v31, %v1426_v15 }
 0x6b1   :  { %v493_v41 = vadd.f32 %v491_v40, %v148_v37  ;;  %v503_v47 = vpop.permute.xlu0 %502 }
 0x6b3   :  { %v494_v42 = vadd.f32 %v493_v41, %v484_v36 }
 0x6b5   :  { %v1238_v43 = vmul.f32 -1.442695, %v494_v42 }
 0x6b7   :  { %1294 = vpow2.f32 %v1238_v43 }
 0x6c4   :  { %v1295_v44 = vpop.eup %1294 }
 0x6c5   :  { %v498_v45 = vadd.f32 1.0, %v1295_v44 }
 0x6c7   :  { %1296 = vrcp.f32 %v498_v45 }
 0x6d4   :  { %v1297_v46 = vpop.eup %1296 }
 0x6d5   :  { %v505_v49 = vmul.f32 %v1297_v46, %v503_v47  ;;  %v512_v53 = vsub.f32 1.0, %v1297_v46  ;;  %v518_v55 = vmul.f32 %v1297_v46, %v1526_v26 }
 0x6d7   :  { %507 = vrot.lane.b32.xlu1 %v505_v49, %s1333_s2 }
 0x749   :  { %v508_v50 = vpop.permute.xlu1 %507 }
 0x74a   :  { %v510_v51 = vadd.f32 %v508_v50, %v493_v41 }
 0x74c   :  { %1298 = vtanh.f32 %v510_v51 }
 0x759   :  { %v1299_v52 = vpop.eup %1298 }
 0x75a   :  { %514 = vrot.lane.b32.xlu0 %v1299_v52, %s1334_s25 }
 0x7cc   :  { %v515_v54 = vpop.permute.xlu0 %514 }
 0x7cd   :  { %v517_v56 = vmul.f32 %v515_v54, %v512_v53 }
 0x7cf   :  { %v1557_v57 = vadd.f32 %v518_v55, %v517_v56 }
 0x7d1   :  { %521 = vrot.lane.b32.xlu1 %v1557_v57, %s1334_s25 }
 0x843   :  { %v522_v58 = vpop.permute.xlu1 %521 }
 0x844   :  { %1239 = vmatmul.mubr.msk.f32.vlgmr.msra.gmra.mxu1 %vm184_vm2, %v522_v58 }
 0x845   :  { %774 = vmatpush1.msra.mxu1 %v1371_v2  ;;  %813 = vmatprep.mubr.f32.mxu1 %v1330_v3 }
 0x846   :  { %775 = vmatprep.subr.mxu1 %v1381_v5 }
 0x847   :  { %776 = vmatpush1.msra.mxu1 %v1390_v7 }
 0x848   :  { %777 = vmatprep.subr.mxu1 %v1399_v9 }
 0x849   :  { %778 = vmatpush1.msra.mxu1 %v1405_v10 }
 0x84a   :  { %779 = vmatprep.subr.mxu1 %v1420_v13 }
 0x84b   :  { %780 = vmatpush1.msra.mxu1 %v1432_v16 }
 0x84c   :  { %997 = vmatprep.subr.mxu1 %v1366_v1 }
 0x904   :  { %v591_v59 = vpop.f32.mrf.mxu1 }
 0x905   :  { %599 = vrot.lane.b32.xlu0 %v591_v59, %s1332_s20  ;;  %v596_v61 = vadd.f32 %v591_v59, %v1467_v22 }
 0x906   :  { %v593_v60 = vpop.f32.mrf.mxu1 }
 0x907   :  { %601 = vrot.lane.b32.xlu1 %v593_v60, %s1332_s20 }
 0x909   :  { %614 = vrot.lane.b32.xlu0 %v596_v61, %s1333_s2 }
 0x977   :  { %v600_v63 = vpop.permute.xlu0 %599 }
 0x979   :  { %v602_v0 = vpop.permute.xlu1 %601 }
 0x97a   :  { %v603_v4 = vsel %vm184_vm2, %v600_v63, %v602_v0 }
 0x97b   :  { %v605_v6 = vadd.f32 %v603_v4, %v153_v62  ;;  %v615_v18 = vpop.permute.xlu0 %614 }
 0x97d   :  { %v606_v8 = vadd.f32 %v605_v6, %v596_v61 }
 0x97f   :  { %v1240_v12 = vmul.f32 -1.442695, %v606_v8 }
 0x981   :  { %1300 = vpow2.f32 %v1240_v12 }
 0x98e   :  { %v1301_v1 = vpop.eup %1300 }
 0x98f   :  { %v610_v14 = vadd.f32 1.0, %v1301_v1 }
 0x991   :  { %1302 = vrcp.f32 %v610_v14 }
 0x99e   :  { %v1303_v17 = vpop.eup %1302 }
 0x99f   :  { %v617_v19 = vmul.f32 %v1303_v17, %v615_v18  ;;  %v624_v24 = vsub.f32 1.0, %v1303_v17  ;;  %v630_v27 = vmul.f32 %v1303_v17, %v1557_v57 }
 0x9a1   :  { %619 = vrot.lane.b32.xlu1 %v617_v19, %s1333_s2 }
 0xa13   :  { %v620_v20 = vpop.permute.xlu1 %619 }
 0xa14   :  { %v622_v21 = vadd.f32 %v620_v20, %v605_v6 }
 0xa16   :  { %1304 = vtanh.f32 %v622_v21 }
 0xa23   :  { %v1305_v23 = vpop.eup %1304 }
 0xa24   :  { %626 = vrot.lane.b32.xlu0 %v1305_v23, %s1334_s25 }
 0xa96   :  { %v627_v25 = vpop.permute.xlu0 %626 }
 0xa97   :  { %v629_v28 = vmul.f32 %v627_v25, %v624_v24  ;;  %v168_v25 = vadd.f32 %v1546_v33, %v1426_v15 }
 0xa99   :  { %v1580_v29 = vadd.f32 %v630_v27, %v629_v28 }
 0xa9b   :  { %633 = vrot.lane.b32.xlu1 %v1580_v29, %s1334_s25 }
 0xb0d   :  { %v634_v34 = vpop.permute.xlu1 %633 }
 0xb0e   :  { %1241 = vmatmul.mubr.msk.f32.vlgmr.msra.gmra.mxu0 %vm184_vm2, %v634_v34 }
 0xb0f   :  { %886 = vmatpush1.msra.mxu0 %v1371_v2  ;;  %925 = vmatprep.mubr.f32.mxu0 %v1330_v3 }
 0xb10   :  { %887 = vmatprep.subr.mxu0 %v1381_v5 }
 0xb11   :  { %888 = vmatpush1.msra.mxu0 %v1390_v7 }
 0xb12   :  { %889 = vmatprep.subr.mxu0 %v1399_v9 }
 0xb13   :  { %890 = vmatpush1.msra.mxu0 %v1405_v10 }
 0xb14   :  { %891 = vmatprep.subr.mxu0 %v1420_v13 }
 0xb15   :  { %892 = vmatpush1.msra.mxu0 %v1432_v16 }
 0xbce   :  { %v703_v35 = vpop.f32.mrf.mxu0 }
 0xbcf   :  { %711 = vrot.lane.b32.xlu0 %v703_v35, %s1332_s20  ;;  %v708_v37 = vadd.f32 %v703_v35, %v1467_v22 }
 0xbd0   :  { %v705_v36 = vpop.f32.mrf.mxu0 }
 0xbd1   :  { %713 = vrot.lane.b32.xlu1 %v705_v36, %s1332_s20 }
 0xbd3   :  { %726 = vrot.lane.b32.xlu0 %v708_v37, %s1333_s2 }
 0xc41   :  { %v712_v39 = vpop.permute.xlu0 %711 }
 0xc43   :  { %v714_v40 = vpop.permute.xlu1 %713 }
 0xc44   :  { %v715_v41 = vsel %vm184_vm2, %v712_v39, %v714_v40 }
 0xc45   :  { %v717_v42 = vadd.f32 %v715_v41, %v158_v38  ;;  %v727_v49 = vpop.permute.xlu0 %726 }
 0xc47   :  { %v718_v43 = vadd.f32 %v717_v42, %v708_v37 }
 0xc49   :  { %v1242_v44 = vmul.f32 -1.442695, %v718_v43 }
 0xc4b   :  { %1306 = vpow2.f32 %v1242_v44 }
 0xc58   :  { %v1307_v45 = vpop.eup %1306 }
 0xc59   :  { %v722_v46 = vadd.f32 1.0, %v1307_v45 }
 0xc5b   :  { %1308 = vrcp.f32 %v722_v46 }
 0xc68   :  { %v1309_v47 = vpop.eup %1308 }
 0xc69   :  { %v729_v50 = vmul.f32 %v1309_v47, %v727_v49  ;;  %v736_v53 = vsub.f32 1.0, %v1309_v47  ;;  %v742_v55 = vmul.f32 %v1309_v47, %v1580_v29 }
 0xc6b   :  { %731 = vrot.lane.b32.xlu1 %v729_v50, %s1333_s2 }
 0xcdd   :  { %v732_v51 = vpop.permute.xlu1 %731 }
 0xcde   :  { %v734_v52 = vadd.f32 %v732_v51, %v717_v42 }
 0xce0   :  { %1310 = vtanh.f32 %v734_v52 }
 0xced   :  { %v1311_v31 = vpop.eup %1310 }
 0xcee   :  { %738 = vrot.lane.b32.xlu0 %v1311_v31, %s1334_s25 }
 0xd60   :  { %v739_v54 = vpop.permute.xlu0 %738 }
 0xd61   :  { %v741_v56 = vmul.f32 %v739_v54, %v736_v53  ;;  %v30_v54 = vld [vmem:[%s1682_s3 + $0x56] ss:$0 sm:$0xff] }
 0xd63   :  { %v1603_v58 = vadd.f32 %v742_v55, %v741_v56  ;;  %v173_v56 = vadd.f32 %v1544_v32, %v1426_v15 }
 0xd65   :  { %745 = vrot.lane.b32.xlu1 %v1603_v58, %s1334_s25 }
 0xdd7   :  { %v746_v59 = vpop.permute.xlu1 %745 }
 0xdd8   :  { %1243 = vmatmul.mubr.msk.f32.vlgmr.msra.gmra.mxu1 %vm184_vm2, %v746_v59 }
 0xdd9   :  { %998 = vmatpush1.msra.mxu1 %v1371_v2  ;;  %1037 = vmatprep.mubr.f32.mxu1 %v1330_v3  ;;  %v163_v3 = vadd.f32 %v1540_v30, %v1426_v15 }
 0xdda   :  { %999 = vmatprep.subr.mxu1 %v1381_v5 }
 0xddb   :  { %1000 = vmatpush1.msra.mxu1 %v1390_v7 }
 0xddc   :  { %1001 = vmatprep.subr.mxu1 %v1399_v9 }
 0xddd   :  { %1002 = vmatpush1.msra.mxu1 %v1405_v10 }
 0xdde   :  { %1003 = vmatprep.subr.mxu1 %v1420_v13 }
 0xddf   :  { %1004 = vmatpush1.msra.mxu1 %v1432_v16 }
 0xe98   :  { %v815_v60 = vpop.f32.mrf.mxu1 }
 0xe99   :  { %823 = vrot.lane.b32.xlu0 %v815_v60, %s1332_s20  ;;  %v820_v2 = vadd.f32 %v815_v60, %v1467_v22 }
 0xe9a   :  { %v817_v61 = vpop.f32.mrf.mxu1 }
 0xe9b   :  { %825 = vrot.lane.b32.xlu1 %v817_v61, %s1332_s20 }
 0xe9d   :  { %838 = vrot.lane.b32.xlu0 %v820_v2, %s1333_s2 }
 0xf0b   :  { %v824_v5 = vpop.permute.xlu0 %823 }
 0xf0d   :  { %v826_v7 = vpop.permute.xlu1 %825 }
 0xf0e   :  { %v827_v9 = vsel %vm184_vm2, %v824_v5, %v826_v7 }
 0xf0f   :  { %v829_v10 = vadd.f32 %v827_v9, %v163_v3  ;;  %v839_v4 = vpop.permute.xlu0 %838 }
 0xf11   :  { %v830_v13 = vadd.f32 %v829_v10, %v820_v2 }
 0xf13   :  { %v1244_v16 = vmul.f32 -1.442695, %v830_v13 }
 0xf15   :  { %1312 = vpow2.f32 %v1244_v16 }
 0xf22   :  { %v1313_v62 = vpop.eup %1312 }
 0xf23   :  { %v834_v63 = vadd.f32 1.0, %v1313_v62 }
 0xf25   :  { %1314 = vrcp.f32 %v834_v63 }
 0xf32   :  { %v1315_v0 = vpop.eup %1314 }
 0xf33   :  { %v841_v6 = vmul.f32 %v1315_v0, %v839_v4  ;;  %v848_v1 = vsub.f32 1.0, %v1315_v0  ;;  %v854_v17 = vmul.f32 %v1315_v0, %v1603_v58 }
 0xf35   :  { %843 = vrot.lane.b32.xlu1 %v841_v6, %s1333_s2 }
 0xfa7   :  { %v844_v8 = vpop.permute.xlu1 %843 }
 0xfa8   :  { %v846_v12 = vadd.f32 %v844_v8, %v829_v10 }
 0xfaa   :  { %1316 = vtanh.f32 %v846_v12 }
 0xfb7   :  { %v1317_v30 = vpop.eup %1316 }
 0xfb8   :  { %850 = vrot.lane.b32.xlu0 %v1317_v30, %s1334_s25 }
0x102a   :  { %v851_v14 = vpop.permute.xlu0 %850 }
0x102b   :  { %v853_v18 = vmul.f32 %v851_v14, %v848_v1 }
0x102d   :  { %v1626_v19 = vadd.f32 %v854_v17, %v853_v18 }
0x102f   :  { %857 = vrot.lane.b32.xlu1 %v1626_v19, %s1334_s25 }
0x10a1   :  { %v858_v20 = vpop.permute.xlu1 %857 }
0x10a2   :  { %1245 = vmatmul.mubr.msk.f32.vlgmr.msra.gmra.mxu0 %vm184_vm2, %v858_v20 }
0x1162   :  { %v927_v21 = vpop.f32.mrf.mxu0 }
0x1163   :  { %935 = vrot.lane.b32.xlu0 %v927_v21, %s1332_s20  ;;  %v932_v24 = vadd.f32 %v927_v21, %v1467_v22 }
0x1164   :  { %v929_v23 = vpop.f32.mrf.mxu0 }
0x1165   :  { %937 = vrot.lane.b32.xlu1 %v929_v23, %s1332_s20 }
0x1167   :  { %950 = vrot.lane.b32.xlu0 %v932_v24, %s1333_s2 }
0x11d5   :  { %v936_v27 = vpop.permute.xlu0 %935 }
0x11d7   :  { %v938_v28 = vpop.permute.xlu1 %937 }
0x11d8   :  { %v939_v34 = vsel %vm184_vm2, %v936_v27, %v938_v28 }
0x11d9   :  { %v941_v35 = vadd.f32 %v939_v34, %v168_v25  ;;  %v951_v41 = vpop.permute.xlu0 %950 }
0x11db   :  { %v942_v36 = vadd.f32 %v941_v35, %v932_v24 }
0x11dd   :  { %v1246_v37 = vmul.f32 -1.442695, %v942_v36 }
0x11df   :  { %1318 = vpow2.f32 %v1246_v37 }
0x11ec   :  { %v1319_v38 = vpop.eup %1318 }
0x11ed   :  { %v946_v39 = vadd.f32 1.0, %v1319_v38 }
0x11ef   :  { %1320 = vrcp.f32 %v946_v39 }
0x11fc   :  { %v1321_v40 = vpop.eup %1320 }
0x11fd   :  { %v953_v42 = vmul.f32 %v1321_v40, %v951_v41  ;;  %v960_v45 = vsub.f32 1.0, %v1321_v40  ;;  %v966_v47 = vmul.f32 %v1321_v40, %v1626_v19  ;;  %v1169_v41 = vlaneseq }
0x11ff   :  { %955 = vrot.lane.b32.xlu1 %v953_v42, %s1333_s2 }
0x1271   :  { %v956_v43 = vpop.permute.xlu1 %955 }
0x1272   :  { %v958_v44 = vadd.f32 %v956_v43, %v941_v35  ;;  %v1170_v43 = vand.u32 127, %v1169_v41 }
0x1274   :  { %1322 = vtanh.f32 %v958_v44  ;;  %v1172_v44 = vshrl.u32 %v1169_v41, 7 }
0x1281   :  { %v1323_v33 = vpop.eup %1322 }
0x1282   :  { %962 = vrot.lane.b32.xlu0 %v1323_v33, %s1334_s25 }
0x12f4   :  { %v963_v46 = vpop.permute.xlu0 %962 }
0x12f5   :  { %v965_v49 = vmul.f32 %v963_v46, %v960_v45  ;;  %v1173_v45 = vsub.s32 %v1170_v43, %v1172_v44 }
0x12f7   :  { %v967_v50 = vadd.f32 %v966_v47, %v965_v49 }
0x12f9   :  { %969 = vrot.lane.b32.xlu1 %v967_v50, %s1334_s25 }
0x136b   :  { %v970_v51 = vpop.permute.xlu1 %969 }
0x136c   :  { %1247 = vmatmul.mubr.msk.f32.vlgmr.msra.gmra.mxu1 %vm184_vm2, %v970_v51 }
0x142c   :  { %v1039_v52 = vpop.f32.mrf.mxu1 }
0x142d   :  { %1047 = vrot.lane.b32.xlu0 %v1039_v52, %s1332_s20  ;;  %v1044_v53 = vadd.f32 %v1039_v52, %v1467_v22 }
0x142e   :  { %v1041_v31 = vpop.f32.mrf.mxu1 }
0x142f   :  { %1049 = vrot.lane.b32.xlu1 %v1041_v31, %s1332_s20 }
0x1431   :  { %1062 = vrot.lane.b32.xlu0 %v1044_v53, %s1333_s2 }
0x1435   :  { %1081 = vrot.lane.b32.xlu0 %v30_v54, %s1332_s20 }
0x149f   :  { %v1048_v55 = vpop.permute.xlu0 %1047 }
0x14a1   :  { %v1050_v59 = vpop.permute.xlu1 %1049 }
0x14a2   :  { %v1051_v60 = vsel %vm184_vm2, %v1048_v55, %v1050_v59 }
0x14a3   :  { %v1053_v61 = vadd.f32 %v1051_v60, %v173_v56  ;;  %v1063_v2 = vpop.permute.xlu0 %1062 }
0x14a5   :  { %v1054_v22 = vadd.f32 %v1053_v61, %v1044_v53 }
0x14a7   :  { %v1248_v3 = vmul.f32 -1.442695, %v1054_v22  ;;  %v1082_v5 = vpop.permute.xlu0 %1081 }
0x14a8   :  { %v1084_v7 = vmul.f32 %v1082_v5, %v1478_v48  ;;  %v1086_v9 = vmul.f32 %v1082_v5, %v1557_v57  ;;  %v1088_v10 = vmul.f32 %v1082_v5, %v1603_v58  ;;  %v1090_v15 = vmul.f32 %v1082_v5, %v967_v50 }
0x14a9   :  { %1324 = vpow2.f32 %v1248_v3  ;;  %v1085_v8 = vmul.f32 %v1082_v5, %v1526_v26  ;;  %v1087_v12 = vmul.f32 %v1082_v5, %v1580_v29  ;;  %v1089_v30 = vmul.f32 %v1082_v5, %v1626_v19 }
0x14aa   :  { %1100 = vrot.lane.b32.xlu0 %v1084_v7, %s1334_s25 }
0x14ae   :  { %1104 = vrot.lane.b32.xlu0 %v1086_v9, %s1334_s25 }
0x14b2   :  { %1108 = vrot.lane.b32.xlu0 %v1088_v10, %s1334_s25 }
0x14b6   :  { %v1325_v32 = vpop.eup %1324  ;;  %1112 = vrot.lane.b32.xlu0 %v1090_v15, %s1334_s25 }
0x14b7   :  { %v1058_v13 = vadd.f32 1.0, %v1325_v32 }
0x14b9   :  { %1326 = vrcp.f32 %v1058_v13 }
0x14c6   :  { %v1327_v16 = vpop.eup %1326 }
0x14c7   :  { %v1065_v62 = vmul.f32 %v1327_v16, %v1063_v2  ;;  %v1072_v1 = vsub.f32 1.0, %v1327_v16  ;;  %v1078_v17 = vmul.f32 %v1327_v16, %v967_v50 }
0x14c9   :  { %1067 = vrot.lane.b32.xlu1 %v1065_v62, %s1333_s2 }
0x151c   :  { %v1101_v48 = vpop.permute.xlu0 %1100 }
0x151d   :  { %v1124_v63 = vsel %vm184_vm2, %v1101_v48, 0.0 }
0x151e   :  { %1125 = vadd.xlane.f32.xlu0 %v1124_v63 }
0x1520   :  { %v1105_v57 = vpop.permute.xlu0 %1104 }
0x1521   :  { %v1130_v0 = vsel %vm184_vm2, %v1105_v57, 0.0 }
0x1522   :  { %1131 = vadd.xlane.f32.xlu0 %v1130_v0 }
0x1524   :  { %v1109_v19 = vpop.permute.xlu0 %1108 }
0x1525   :  { %v1136_v28 = vsel %vm184_vm2, %v1109_v19, 0.0 }
0x1528   :  { %v1113_v34 = vpop.permute.xlu0 %1112 }
0x1529   :  { %v1142_v35 = vsel %vm184_vm2, %v1113_v34, 0.0 }
0x153b   :  { %v1068_v58 = vpop.permute.xlu1 %1067 }
0x153c   :  { %v1070_v4 = vadd.f32 %v1068_v58, %v1053_v61 }
0x153e   :  { %1328 = vtanh.f32 %v1070_v4 }
0x154b   :  { %v1329_v6 = vpop.eup %1328 }
0x154c   :  { %1074 = vrot.lane.b32.xlu1 %v1329_v6, %s1334_s25 }
0x1550   :  { %1102 = vrot.lane.b32.xlu1 %v1085_v8, %s1334_s25 }
0x1554   :  { %1106 = vrot.lane.b32.xlu1 %v1087_v12, %s1334_s25 }
0x1558   :  { %1110 = vrot.lane.b32.xlu1 %v1089_v30, %s1334_s25 }
0x15a7   :  { %v1126_v42 = vpop.xlane.xlu0 %1125 }
0x15ab   :  { %v1132_v49 = vpop.xlane.xlu0 %1131 }
0x15be   :  { %v1075_v14 = vpop.permute.xlu1 %1074 }
0x15bf   :  { %v1077_v18 = vmul.f32 %v1075_v14, %v1072_v1 }
0x15c1   :  { %v1079_v20 = vadd.f32 %v1078_v17, %v1077_v18 }
0x15c2   :  { %v1103_v21 = vpop.permute.xlu1 %1102 }
0x15c3   :  { %v1091_v23 = vmul.f32 %v1082_v5, %v1079_v20  ;;  %v1127_v27 = vsel %vm184_vm2, %v1103_v21, 0.0 }
0x15c5   :  { %1114 = vrot.lane.b32.xlu1 %v1091_v23, %s1334_s25 }
0x15c6   :  { %v1107_v26 = vpop.permute.xlu1 %1106 }
0x15c7   :  { %v1133_v24 = vsel %vm184_vm2, %v1107_v26, 0.0 }
0x15c8   :  { %1134 = vadd.xlane.f32.xlu0 %v1133_v24 }
0x15ca   :  { %v1111_v29 = vpop.permute.xlu1 %1110 }
0x15cb   :  { %v1139_v25 = vsel %vm184_vm2, %v1111_v29, 0.0 }
0x15cc   :  { %1140 = vadd.xlane.f32.xlu0 %v1139_v25 }
0x15e9   :  { %1128 = vadd.xlane.f32.xlu1 %v1127_v27 }
0x15ed   :  { %1137 = vadd.xlane.f32.xlu1 %v1136_v28 }
0x15f1   :  { %1143 = vadd.xlane.f32.xlu1 %v1142_v35 }
0x1602   :  { %1150 = vperm.xlu1 %1280, %v1410_v11  }
0x1637   :  { %v1115_v36 = vpop.permute.xlu1 %1114 }
0x1638   :  { %v1145_v37 = vsel %vm184_vm2, %v1115_v36, 0.0 }
0x1639   :  { %1146 = vadd.xlane.f32.xlu0 %v1145_v37 }
0x1651   :  { %v1135_v11 = vpop.xlane.xlu0 %1134 }
0x1655   :  { %v1141_v60 = vpop.xlane.xlu0 %1140 }
0x1672   :  { %v1129_v38 = vpop.xlane.xlu1 %1128 }
0x1676   :  { %v1138_v39 = vpop.xlane.xlu1 %1137 }
0x167a   :  { %v1144_v40 = vpop.xlane.xlu1 %1143 }
0x167e   :  { %v1151_v33 = vpop.permute.xlu1 %1150 }
0x167f   :  { %v1153_v46 = vadd.f32 %v1151_v33, %v1126_v42  ;;  %v1154_v47 = vadd.f32 %v1151_v33, %v1129_v38  ;;  %v1155_v50 = vadd.f32 %v1151_v33, %v1132_v49  ;;  %v1156_v53 = vadd.f32 %v1151_v33, %v1135_v11 }
0x1680   :  { %v1157_v55 = vadd.f32 %v1151_v33, %v1138_v39  ;;  %v1158_v61 = vadd.f32 %v1151_v33, %v1141_v60  ;;  %v1159_v3 = vadd.f32 %v1151_v33, %v1144_v40 }
0x1681   :  { %v1174_v51 = vrot.slane %v1153_v46, %v1173_v45  ;;  %v1178_v52 = vrot.slane %v1154_v47, %v1173_v45  ;;  %v1182_v31 = vrot.slane %v1155_v50, %v1173_v45  ;;  %v1186_v59 = vrot.slane %v1156_v53, %v1173_v45 }
0x1682   :  { %v1190_v22 = vrot.slane %v1157_v55, %v1173_v45  ;;  %v1194_v7 = vrot.slane %v1158_v61, %v1173_v45  ;;  %v1198_v32 = vrot.slane %v1159_v3, %v1173_v45 }
0x1683   :  { %v1204_v54 = vsel %vm1203_vm3, %v1178_v52, %v1174_v51 }
0x1684   :  { %v1206_v56 = vsel %vm1205_vm4, %v1182_v31, %v1204_v54 }
0x1685   :  { %v1208_v2 = vsel %vm1207_vm5, %v1186_v59, %v1206_v56 }
0x1686   :  { %v1210_v5 = vsel %vm1209_vm6, %v1190_v22, %v1208_v2 }
0x1687   :  { %v1212_v15 = vsel %vm1211_vm7, %v1194_v7, %v1210_v5 }
0x1688   :  { %v1214_v16 = vsel %vm1213_vm8, %v1198_v32, %v1212_v15 }
0x16c2   :  { %v1147_v9 = vpop.xlane.xlu0 %1146 }
0x16c3   :  { %v1160_v10 = vadd.f32 %v1151_v33, %v1147_v9 }
0x16c5   :  { %v1202_v13 = vrot.slane %v1160_v10, %v1173_v45 }
0x16c7   :  { %v1216_v62 = vsel %vm1215_vm9, %v1202_v13, %v1214_v16 }
0x16c8   :  { %1219 = vst.msk [vmem:[%s1686_s4] sm:$0xff] %vm1218_vm10, %v1216_v62 }

</bundles_post_ra>
